<compile_context>
chip_gen: v6e
topology: v6e:2x2x1
jax: 0.10.0
libtpu: 0.0.40
codegen_flags: <defaults>
</compile_context>

<pallas_src>
import functools

import jax
import jax.numpy as jnp
from jax.experimental import pallas as pl
from jax.experimental.pallas import tpu as pltpu


def _round_up(x: int, m: int) -> int:
    return (x + m - 1) // m * m


def _pick_tile(dim: int, max_tile: int, align: int) -> int:
    """Largest useful tile <= ~max_tile that minimizes padding of `dim`.

    If the (aligned) dim fits in one tile, use exactly that.  Otherwise split
    the dim into ceil(dim / max_tile) balanced tiles so the total padding is at
    most (n_tiles * (align - 1)) instead of up to a full tile.
    """
    dim_aligned = _round_up(dim, align)
    if dim_aligned <= max_tile:
        return dim_aligned
    n_tiles = -(-dim // max_tile)
    return _round_up(-(-dim // n_tiles), align)


# --------------------------------------------------------------------------- #
# Kernels
# --------------------------------------------------------------------------- #
def _linear_kernel(x_ref, wt_ref, b_ref, o_ref, acc_ref):
    # x_ref: (tm, tk)  wt_ref: (tk, tn)  b_ref: (1, tn) f32
    # o_ref: (tm, tn)  acc_ref: (tm, tn) f32 scratch, resident across the K axis
    k = pl.program_id(2)

    @pl.when(k == 0)
    def _init():
        # Fold the bias into the accumulator init (no per-step VPU add).
        acc_ref[...] = jnp.broadcast_to(b_ref[...], acc_ref.shape)

    acc_ref[...] += jnp.dot(
        x_ref[...], wt_ref[...], preferred_element_type=jnp.float32
    )

    @pl.when(k == pl.num_programs(2) - 1)
    def _finalize():
        o_ref[...] = acc_ref[...].astype(o_ref.dtype)


def _linear_kernel_single_k(x_ref, wt_ref, b_ref, o_ref):
    # Fast path when the full contraction fits in one K tile: no f32 scratch,
    # no pl.when branches, result goes straight to the output tile.
    acc = jnp.dot(x_ref[...], wt_ref[...], preferred_element_type=jnp.float32)
    o_ref[...] = (acc + b_ref[...]).astype(o_ref.dtype)


# --------------------------------------------------------------------------- #
# One-time weight preparation (hoist transpose/cast/pad out of the hot path)
# --------------------------------------------------------------------------- #
def prepare_weight(weight, *, compute_dtype=jnp.bfloat16, tn=1024, tk=512):
    """Pre-transpose/cast/pad a (F_out, F_in) weight to (k_pad, n_pad).

    Pass the result to bias_detached_linear(..., weight_is_prepared=True) with
    the same compute_dtype / tn / tk so the per-call weight transpose+pad (a
    full HBM read+write of K*N) is done exactly once.
    """
    f_out, f_in = weight.shape
    tn_ = _pick_tile(f_out, tn, 128)
    tk_ = _pick_tile(f_in, tk, 128)
    n_pad = _round_up(f_out, tn_)
    k_pad = _round_up(f_in, tk_)
    w_t = weight.T.astype(jnp.dtype(compute_dtype))   # (F_in, F_out): lane-dense RHS
    if (k_pad, n_pad) != (f_in, f_out):
        w_t = jnp.pad(w_t, ((0, k_pad - f_in), (0, n_pad - f_out)))
    return w_t


# --------------------------------------------------------------------------- #
# Wrapper
# --------------------------------------------------------------------------- #
@functools.partial(
    jax.jit,
    static_argnames=("compute_dtype", "tm", "tn", "tk", "weight_is_prepared"),
)
def bias_detached_linear(
    x,
    weight,
    bias,
    *,
    compute_dtype=None,
    tm=512,
    tn=1024,
    tk=512,
    weight_is_prepared=False,
):
    """Pallas equivalent of BiasDetachedLinear.forward.

    x: [..., F_in]
    weight: [F_out, F_in]        (or prepared (k_pad, n_pad) if weight_is_prepared)
    bias:   [F_out]
    returns [..., F_out]
    """
    # TODO(synk): forward-only kernel; bias.detach() is mirrored with
    # stop_gradient but no custom VJP is provided for the pallas_call itself.
    bias = jax.lax.stop_gradient(bias)

    out_dtype = x.dtype
    if compute_dtype is None:
        # bf16 MXU path (f32 accumulation) by default: halves HBM traffic and
        # ~4x MXU throughput vs. f32 on v6e/v7x.
        compute_dtype = jnp.bfloat16 if x.dtype == jnp.float32 else x.dtype
    compute_dtype = jnp.dtype(compute_dtype)

    orig_shape = x.shape
    f_in = orig_shape[-1]
    f_out = bias.shape[0]

    x2d = x.reshape(-1, f_in).astype(compute_dtype)
    m = x2d.shape[0]

    # Sublane alignment: 8 rows for 4-byte dtypes, 16 for 2-byte (bf16 packing).
    sub = 8 if compute_dtype.itemsize >= 4 else 16

    tm_ = _pick_tile(m, tm, sub)
    tn_ = _pick_tile(f_out, tn, 128)
    tk_ = _pick_tile(f_in, tk, 128)

    m_pad = _round_up(m, tm_)
    n_pad = _round_up(f_out, tn_)
    k_pad = _round_up(f_in, tk_)

    # Zero padding: exact for the matmul (zeros contribute nothing along K;
    # padded M rows / N columns are sliced off below).
    if (m_pad, k_pad) != (m, f_in):
        x2d = jnp.pad(x2d, ((0, m_pad - m), (0, k_pad - f_in)))

    if weight_is_prepared:
        if weight.shape != (k_pad, n_pad):
            raise ValueError(
                f"prepared weight has shape {weight.shape}, expected "
                f"{(k_pad, n_pad)}; call prepare_weight with matching tn/tk."
            )
        w_t = weight.astype(compute_dtype)   # no-op if already compute_dtype
    else:
        w_t = weight.T.astype(compute_dtype)          # (F_in, F_out)
        if (k_pad, n_pad) != (f_in, f_out):
            w_t = jnp.pad(w_t, ((0, k_pad - f_in), (0, n_pad - f_out)))

    b2d = bias.reshape(1, f_out).astype(jnp.float32)
    if n_pad != f_out:
        b2d = jnp.pad(b2d, ((0, 0), (0, n_pad - f_out)))

    grid_m = m_pad // tm_
    grid_n = n_pad // tn_
    grid_k = k_pad // tk_

    itm = compute_dtype.itemsize
    out_itm = jnp.dtype(out_dtype).itemsize

    # Actual streamed HBM traffic: x is re-read grid_n times, W^T grid_m times.
    cost = pl.CostEstimate(
        flops=2 * m_pad * k_pad * n_pad,
        bytes_accessed=(
            grid_n * m_pad * k_pad * itm
            + grid_m * k_pad * n_pad * itm
            + m_pad * n_pad * out_itm
        ),
        transcendentals=0,
    )

    # VMEM limit = actual double-buffered tile footprint + headroom, never the
    # full physical VMEM (which would be all of a v7x TensorCore's 64 MiB).
    vmem_need = (
        2 * tm_ * tk_ * itm           # x tiles (double-buffered)
        + 2 * tk_ * tn_ * itm         # W^T tiles
        + 2 * 8 * tn_ * 4             # bias tiles (sublane-padded)
        + 2 * tm_ * tn_ * out_itm     # output tiles
        + (tm_ * tn_ * 4 if grid_k > 1 else 0)   # f32 accumulator scratch
    )
    vmem_limit = max(32 * 1024 * 1024, vmem_need + 8 * 1024 * 1024)

    if grid_k == 1:
        out = pl.pallas_call(
            _linear_kernel_single_k,
            out_shape=jax.ShapeDtypeStruct((m_pad, n_pad), out_dtype),
            grid_spec=pltpu.PrefetchScalarGridSpec(
                num_scalar_prefetch=0,
                grid=(grid_m, grid_n),
                in_specs=[
                    pl.BlockSpec((tm_, tk_), lambda i, j: (i, 0)),   # x tile
                    pl.BlockSpec((tk_, tn_), lambda i, j: (0, j)),   # W^T tile
                    pl.BlockSpec((1, tn_), lambda i, j: (0, j)),     # bias tile
                ],
                out_specs=pl.BlockSpec((tm_, tn_), lambda i, j: (i, j)),
                scratch_shapes=[],
            ),
            compiler_params=pltpu.CompilerParams(
                dimension_semantics=("parallel", "parallel"),
                vmem_limit_bytes=vmem_limit,
            ),
            cost_estimate=cost,
        )(x2d, w_t, b2d)
    else:
        out = pl.pallas_call(
            _linear_kernel,
            out_shape=jax.ShapeDtypeStruct((m_pad, n_pad), out_dtype),
            grid_spec=pltpu.PrefetchScalarGridSpec(
                num_scalar_prefetch=0,
                grid=(grid_m, grid_n, grid_k),
                in_specs=[
                    pl.BlockSpec((tm_, tk_), lambda i, j, k: (i, k)),   # x tile
                    pl.BlockSpec((tk_, tn_), lambda i, j, k: (k, j)),   # W^T tile
                    pl.BlockSpec((1, tn_), lambda i, j, k: (0, j)),     # bias tile
                ],
                out_specs=pl.BlockSpec((tm_, tn_), lambda i, j, k: (i, j)),
                scratch_shapes=[pltpu.VMEM((tm_, tn_), jnp.float32)],
            ),
            compiler_params=pltpu.CompilerParams(
                dimension_semantics=("parallel", "parallel", "arbitrary"),
                vmem_limit_bytes=vmem_limit,
            ),
            cost_estimate=cost,
        )(x2d, w_t, b2d)

    out = out[:m, :f_out]
    return out.reshape(*orig_shape[:-1], f_out)


# --------------------------------------------------------------------------- #
# Self-test
# --------------------------------------------------------------------------- #
if __name__ == "__main__":
    key = jax.random.PRNGKey(0)
    kx, kw, kb, kx2, kw2, kb2 = jax.random.split(key, 6)

    # --- Test 1: small shapes consistent with nn.Linear(32, 16), 3-D input ---
    # (single-K fast path, exact f32 compute)
    batch, seq, in_features, out_features = 2, 4, 32, 16
    bound = 1.0 / (in_features ** 0.5)
    x = jax.random.normal(kx, (batch, seq, in_features), dtype=jnp.float32)
    weight = jax.random.uniform(
        kw, (out_features, in_features), minval=-bound, maxval=bound,
        dtype=jnp.float32)
    bias = jax.random.uniform(
        kb, (out_features,), minval=-bound, maxval=bound, dtype=jnp.float32)

    y_ref = x @ weight.T + bias

    y = jax.block_until_ready(
        bias_detached_linear(x, weight, bias, compute_dtype=jnp.float32))
    assert y.shape == (batch, seq, out_features)
    assert jnp.allclose(y, y_ref, atol=1e-5, rtol=1e-5), "f32 small test failed"

    # Default path (bf16 compute, f32 accumulation).
    y_bf = jax.block_until_ready(bias_detached_linear(x, weight, bias))
    assert y_bf.dtype == jnp.float32
    assert jnp.allclose(y_bf, y_ref, atol=3e-2, rtol=3e-2), "bf16 small test failed"

    # --- Test 2: multi-tile 3-D grid (small tiles force M/N/K tiling + acc) ---
    M2, K2, N2 = 384, 320, 272
    bound2 = 1.0 / (K2 ** 0.5)
    x2 = jax.random.normal(kx2, (M2, K2), dtype=jnp.float32)
    w2 = jax.random.uniform(kw2, (N2, K2), minval=-bound2, maxval=bound2,
                            dtype=jnp.float32)
    b2 = jax.random.uniform(kb2, (N2,), minval=-bound2, maxval=bound2,
                            dtype=jnp.float32)
    y2_ref = x2 @ w2.T + b2

    y2 = jax.block_until_ready(
        bias_detached_linear(x2, w2, b2, compute_dtype=jnp.float32,
                             tm=128, tn=128, tk=128))
    assert jnp.allclose(y2, y2_ref, atol=1e-4, rtol=1e-5), "multi-tile test failed"

    # --- Test 3: hoisted weight prep + default bf16 compute path --------------
    w2_prep = prepare_weight(w2, compute_dtype=jnp.bfloat16)
    y3 = jax.block_until_ready(
        bias_detached_linear(x2, w2_prep, b2, weight_is_prepared=True))
    assert jnp.allclose(y3, y2_ref, atol=5e-2, rtol=5e-2), "prepared-bf16 test failed"

    print("KERNEL_OK")
</pallas_src>

<mosaic_0001>
module attributes {stable_mosaic.version = 11 : i64} {
  func.func @_linear_kernel_single_k(%arg0: i32, %arg1: i32, %arg2: memref<8x128xf32, #tpu.memory_space<vmem>>, %arg3: memref<128x128xf32, #tpu.memory_space<vmem>>, %arg4: memref<1x128xf32, #tpu.memory_space<vmem>>, %arg5: memref<8x128xf32, #tpu.memory_space<vmem>>) attributes {dimension_semantics = [#tpu.dimension_semantics<parallel>, #tpu.dimension_semantics<parallel>], iteration_bounds = array<i64: 1, 1>, scalar_prefetch = 0 : i64, scratch_operands = 0 : i64, tpu.core_type = #tpu.core_type<tc>, window_params = [{transform_indices = @transform_0, window_bounds = array<i64: 8, 128>}, {transform_indices = @transform_1, window_bounds = array<i64: 128, 128>}, {transform_indices = @transform_2, window_bounds = array<i64: 1, 128>}, {transform_indices = @transform_3, window_bounds = array<i64: 8, 128>}]} {
    %c0 = arith.constant 0 : index
    %c0_0 = arith.constant 0 : index
    %0 = vector.load %arg2[%c0, %c0_0] : memref<8x128xf32, #tpu.memory_space<vmem>>, vector<8x128xf32>
    %c0_1 = arith.constant 0 : index
    %c0_2 = arith.constant 0 : index
    %1 = vector.load %arg3[%c0_1, %c0_2] : memref<128x128xf32, #tpu.memory_space<vmem>>, vector<128x128xf32>
    %cst = arith.constant dense<0.000000e+00> : vector<8x128xf32>
    %2 = tpu.matmul %0, %1, %cst {dimension_numbers = #tpu.dot_dimension_numbers<[1], [0], [0], [1], [0, 0, 1, 1], [], []>} : vector<8x128xf32>, vector<128x128xf32>, vector<8x128xf32> -> vector<8x128xf32>
    %c0_3 = arith.constant 0 : index
    %c0_4 = arith.constant 0 : index
    %3 = vector.load %arg4[%c0_3, %c0_4] : memref<1x128xf32, #tpu.memory_space<vmem>>, vector<1x128xf32>
    %4 = vector.broadcast %3 : vector<1x128xf32> to vector<8x128xf32>
    %5 = arith.addf %2, %4 : vector<8x128xf32>
    %c0_5 = arith.constant 0 : index
    %c0_6 = arith.constant 0 : index
    %6 = vector.load %arg5[%c0_5, %c0_6] : memref<8x128xf32, #tpu.memory_space<vmem>>, vector<8x128xf32>
    tpu.vector_store %arg5[%c0_5, %c0_6], %5 {strides = array<i32>} : memref<8x128xf32, #tpu.memory_space<vmem>>, vector<8x128xf32>,
    return
  }
  func.func @transform_0(%arg0: i32, %arg1: i32) -> (i32, i32) {
    %c0_i32 = arith.constant 0 : i32
    %c0_i32_0 = arith.constant 0 : i32
    return %arg0, %c0_i32 : i32, i32
  }
  func.func @transform_1(%arg0: i32, %arg1: i32) -> (i32, i32) {
    %c0_i32 = arith.constant 0 : i32
    %c0_i32_0 = arith.constant 0 : i32
    return %c0_i32, %arg1 : i32, i32
  }
  func.func @transform_2(%arg0: i32, %arg1: i32) -> (i32, i32) {
    %c0_i32 = arith.constant 0 : i32
    %c0_i32_0 = arith.constant 0 : i32
    return %c0_i32, %arg1 : i32, i32
  }
  func.func @transform_3(%arg0: i32, %arg1: i32) -> (i32, i32) {
    %c0_i32 = arith.constant 0 : i32
    return %arg0, %arg1 : i32, i32
  }
}

</mosaic_0001>

<bundles_post_ra>
// kernel: bias_detached_linear.1
= control target key start
LH: loop header
LB: loop body
LE: loop exit
PB: predicated region body
PF: predicated region fallthrough
CT: control target
= control target key end

     0   :  { %v202_v1 = vmov 0.0   ;;  %vm203_vm0 = vmmov 0   ;;  %s282_s0 = inlined_call_operand.vmem [shape: f32[8,128], index: 0, kind: input, shape index: {}]   ;;  %s283_s1 = inlined_call_operand.vmem [shape: f32[128,128], index: 1, kind: input, shape index: {}]   ;;  %s284_s2 = inlined_call_operand.vmem [shape: f32[1,128], index: 2, kind: input, shape index: {}]   ;;  %s285_s3 = inlined_call_operand.hbm [shape: f32[8,128], index: 3, kind: output, shape index: {}]  }
   0x1   :  { %v31_v0 = vld [vmem:[%s283_s1 + $0x78] sm:$0xff]  ;;  %142 = vmatprep.subr.mxu0 %v202_v1  ;;  %v30_v2 = vld [vmem:[%s283_s1 + $0x70] sm:$0xff]  ;;  %174 = vmatprep.mubr.msk.f32.mxu0 %vm203_vm0, %v202_v1  ;;  %v29_v3 = vld [vmem:[%s283_s1 + $0x68] sm:$0xff] }
   0x2   :  { %143 = vmatpush3.msra.mxu0 %v31_v0  ;;  %v28_v4 = vld [vmem:[%s283_s1 + $0x60] sm:$0xff] }
   0x3   :  { %144 = vmatprep.subr.mxu0 %v202_v1 }
   0x4   :  { %145 = vmatpush3.msra.mxu0 %v30_v2 }
   0x5   :  { %146 = vmatprep.subr.mxu0 %v202_v1 }
   0x6   :  { %147 = vmatpush3.msra.mxu0 %v29_v3 }
   0x7   :  { %8 = vsyncpa [#allocation3], 0  ;;  %148 = vmatprep.subr.mxu0 %v202_v1  ;;  %v27_v5 = vld [vmem:[%s283_s1 + $0x58] sm:$0xff]  ;;  %v26_v6 = vld [vmem:[%s283_s1 + $0x50] sm:$0xff]  ;;  %s204_s21 = smov [#allocation2]  }
   0x8   :  { %149 = vmatpush3.msra.mxu0 %v28_v4  ;;  %v25_v7 = vld [vmem:[%s283_s1 + $0x48] sm:$0xff]  ;;  %v24_v8 = vld [vmem:[%s283_s1 + $0x40] sm:$0xff]  ;;  %v23_v9 = vld [vmem:[%s283_s1 + $0x38] sm:$0xff]  ;;  %s116_s22 = sshll.u32 %s204_s21, 4  ;;  %s117_s22 = int_to_ptr.vmem [resolvable:$true] %s116_s22 }
   0x9   :  { %150 = vmatprep.subr.mxu0 %v202_v1  ;;  %v22_v10 = vld [vmem:[%s283_s1 + $0x30] sm:$0xff]  ;;  %v21_v11 = vld [vmem:[%s283_s1 + $0x28] sm:$0xff]  ;;  %v20_v12 = vld [vmem:[%s283_s1 + $0x20] sm:$0xff]  ;;  %p185_p1 = scmp.lt.s32.totalorder %s117_s22, %s117_s22 }
   0xa   :  { %151 = vmatpush3.msra.mxu0 %v27_v5  ;;  %v19_v13 = vld [vmem:[%s283_s1 + $0x18] sm:$0xff]  ;;  %v18_v14 = vld [vmem:[%s283_s1 + $0x10] sm:$0xff]  ;;  %v17_v15 = vld [vmem:[%s283_s1 + $0x8] sm:$0xff] }
   0xb   :  { %152 = vmatprep.subr.mxu0 %v202_v1  ;;  %v16_v16 = vld [vmem:[%s283_s1] sm:$0xff]  ;;  %s180_s1 = scalar_lea.vmem %s117_s22, 128 }
   0xc   :  { %153 = vmatpush3.msra.mxu0 %v26_v6  ;;  %v15_v17 = vld [vmem:[%s282_s0] sm:$0xff]  ;;  %p181_p0 = scmp.ne.s32.totalorder %s117_s22, %s180_s1  ;;  %p186_p2 = scmp.lt.s32.totalorder %s180_s1, %s180_s1 }
   0xd   :  { %154 = vmatprep.subr.mxu0 %v202_v1  ;;  %v124_v18 = vld [vmem:[%s284_s2] ss:$0 sm:$0xff] }
   0xe   :  { %155 = vmatpush3.msra.mxu0 %v25_v7  ;;  %p187_p3 = por %p186_p2, %p185_p1 }
   0xf   :  { %156 = vmatprep.subr.mxu0 %v202_v1 }
  0x10   :  { %157 = vmatpush3.msra.mxu0 %v24_v8  ;;  %p188_p4 = pnand %p187_p3, %p181_p0 }
  0x11   :  { %158 = vmatprep.subr.mxu0 %v202_v1 }
  0x12   :  { %159 = vmatpush3.msra.mxu0 %v23_v9 }
  0x13   :  { %160 = vmatprep.subr.mxu0 %v202_v1 }
  0x14   :  { %161 = vmatpush3.msra.mxu0 %v22_v10 }
  0x15   :  { %162 = vmatprep.subr.mxu0 %v202_v1 }
  0x16   :  { %163 = vmatpush3.msra.mxu0 %v21_v11 }
  0x17   :  { %164 = vmatprep.subr.mxu0 %v202_v1 }
  0x18   :  { %165 = vmatpush3.msra.mxu0 %v20_v12 }
  0x19   :  { %166 = vmatprep.subr.mxu0 %v202_v1 }
  0x1a   :  { %167 = vmatpush3.msra.mxu0 %v19_v13 }
  0x1b   :  { %168 = vmatprep.subr.mxu0 %v202_v1 }
  0x1c   :  { %169 = vmatpush3.msra.mxu0 %v18_v14 }
  0x1d   :  { %170 = vmatprep.subr.mxu0 %v202_v1 }
  0x1e   :  { %171 = vmatpush3.msra.mxu0 %v17_v15 }
  0x1f   :  { %172 = vmatprep.subr.mxu0 %v202_v1 }
  0x20   :  { %173 = vmatpush3.msra.mxu0 %v16_v16 }
  0x21   :  { %175 = vmatmul.mubr.f32.vlgmr.msra.gmra.mxu0 %v15_v17 }
  0xe1   :  { %v105_v19 = vpop.f32.mrf.mxu0 }
  0xe2   :  { %v106_v20 = vadd.f32 %v124_v18, %v105_v19 }
  0xe3   :  { %v176_v21 = vpop.f32.mrf.mxu0 }
  0xe4   :  { %109 = vst [vmem:[#allocation2] sm:$0xff] %v106_v20 }
  0xe5   :  { %191 = shalt.err (!%p188_p4)
}
  0xe6   :  { %119 = dma.vmem_to_hbm [thread:$0]  %s117_s22, 128, %s285_s3, [#allocation3]  }
  0xe7   :  { %200 = dma.done.wait [#allocation3], 128  }
  0xe8   :  { %201 = vsyncadd [#allocation3], 4294967168 }
  0xe9   :  { %123 = vsyncpa [#allocation3], 1 }

</bundles_post_ra>
